<compile_context>
chip_gen: v6e
topology: v6e:2x2x1
jax: 0.10.0
libtpu: 0.0.40
codegen_flags: <defaults>
</compile_context>

<pallas_src>
import functools

import jax
import jax.numpy as jnp
import numpy as np
from jax.experimental import pallas as pl
from jax.experimental.pallas import tpu as pltpu


def _round_up(x, m):
    return ((x + m - 1) // m) * m


def _vmem_plan():
    """Return (slab byte budget, vmem_limit_bytes, tile_n cap) per TPU generation."""
    big_vmem = False
    try:
        cap = int(pltpu.get_tpu_info().vmem_capacity_bytes)
        big_vmem = cap >= 96 * 1024 * 1024          # v5e / v6e: 128 MiB physical VMEM
    except Exception:
        big_vmem = False                             # unknown -> assume v7x-sized VMEM
    if big_vmem:
        return 48 * 1024 * 1024, 64 * 1024 * 1024, 4096
    return 24 * 1024 * 1024, 32 * 1024 * 1024, 2048  # v7x: 64 MiB physical VMEM


def _sparse_mm_kernel(k_ref, f_ref, o_ref):
    # k_ref: (M, K) resident weight block (constant index_map)
    # f_ref: (K, tile_n) streamed slab of gathered sparse features
    # o_ref: (M, tile_n) output slab (lane-dense along N -> unmasked stores)
    o_ref[...] = jnp.dot(
        k_ref[...], f_ref[...], preferred_element_type=jnp.float32
    ).astype(o_ref.dtype)


def sparse_conv2d_matmul(kernel_d2s, sparse_feature, *, tile_n=None,
                         compute_dtype=jnp.bfloat16, out_dtype=jnp.float32):
    """fea_d2s = kernel_d2s @ sparse_feature, computed with a Pallas TPU matmul kernel."""
    M, K = kernel_d2s.shape
    K2, N = sparse_feature.shape
    assert K == K2

    in_itemsize = jnp.dtype(compute_dtype).itemsize
    out_itemsize = jnp.dtype(out_dtype).itemsize

    w = kernel_d2s.astype(compute_dtype)       # no-op when already compute_dtype
    f = sparse_feature.astype(compute_dtype)   # no-op: gather already emits compute_dtype

    budget, vmem_limit, tile_cap = _vmem_plan()

    # Largest lane-dense tile_n fitting the per-generation VMEM budget
    # (double-buffered feature + output slabs, resident weight block).
    weight_bytes = 2 * M * K * in_itemsize
    per_col = 2 * K * in_itemsize + 2 * M * out_itemsize
    max_tile = max(128, (budget - weight_bytes) // max(per_col, 1))
    max_tile = max(128, (max_tile // 128) * 128)
    if tile_n is None:
        tile_n = min(tile_cap, _round_up(N, 128), max_tile)
    # Keep >= 2 grid steps when N allows it so both v7x TensorCores get work.
    tile_n = min(tile_n, max(128, _round_up(pl.cdiv(N, 2), 128)))
    tile_n = max(128, (tile_n // 128) * 128)

    grid = (pl.cdiv(N, tile_n),)   # ragged last block: output store is masked by Pallas

    cost = pl.CostEstimate(
        flops=2 * M * K * N,
        transcendentals=0,
        bytes_accessed=(M * K * in_itemsize
                        + K * N * in_itemsize
                        + M * N * out_itemsize),
    )

    return pl.pallas_call(
        _sparse_mm_kernel,
        out_shape=jax.ShapeDtypeStruct((M, N), out_dtype),
        grid_spec=pltpu.PrefetchScalarGridSpec(
            num_scalar_prefetch=0,
            grid=grid,
            in_specs=[
                pl.BlockSpec((M, K), lambda j: (0, 0)),        # weight resident
                pl.BlockSpec((K, tile_n), lambda j: (0, j)),   # feature slab
            ],
            out_specs=pl.BlockSpec((M, tile_n), lambda j: (0, j)),
        ),
        compiler_params=pltpu.CompilerParams(
            dimension_semantics=("parallel",),
            vmem_limit_bytes=vmem_limit,
        ),
        cost_estimate=cost,
    )(w, f)


def _mask_select(feature, h_idx, w_idx, *, kernel_size, compute_dtype):
    """Matches PyTorch mask_select. The gather runs in compute_dtype (bf16) so the
    dominant (9C, num) slab is written once, already in the kernel's input dtype."""
    c = feature.shape[1]
    img = feature[0].astype(compute_dtype)                   # (C, H, W)
    if kernel_size == 1:
        h, w = img.shape[1], img.shape[2]
        flat = img.reshape(c, h * w)
        idx = (h_idx * w + w_idx).reshape(-1)
        return jnp.take(flat, idx, axis=1).reshape(c, -1)    # (C, num)
    # kernel_size == 3: gather from the zero-padded image with one flat take.
    padded = jnp.pad(img, ((0, 0), (1, 1), (1, 1)))
    hp, wp = padded.shape[1], padded.shape[2]
    flat = padded.reshape(c, hp * wp)
    idx = (h_idx * wp + w_idx).reshape(-1)                    # (9*num,), kpos-major
    gathered = jnp.take(flat, idx, axis=1)                    # (C, 9*num)
    return gathered.reshape(9 * c, -1)                        # row = c*9 + kpos


def _sparse_conv2d_forward(kernel_d2s, feature, h_idx, w_idx, *,
                           kernel_size, compute_dtype, out_dtype):
    sparse_feature = _mask_select(feature, h_idx, w_idx,
                                  kernel_size=kernel_size, compute_dtype=compute_dtype)
    return sparse_conv2d_matmul(kernel_d2s, sparse_feature,
                                compute_dtype=compute_dtype, out_dtype=out_dtype)


class SparseConv2d:
    """JAX re-implementation of mmedit Sparse_conv2d forward."""

    def __init__(self, in_planes, out_planes, kernel_size, key, init_weight=False,
                 compute_dtype=jnp.bfloat16, out_dtype=jnp.float32):
        assert kernel_size in (1, 3)
        self.kernel_size = kernel_size
        fan_in = in_planes * kernel_size * kernel_size
        # Deterministic kaiming-style (fan_in) init, no checkpoint loading.
        w = jax.random.normal(
            key, (out_planes, in_planes, kernel_size, kernel_size), dtype=jnp.float32
        ) * jnp.sqrt(2.0 / fan_in)
        if init_weight:
            w = w * 0.1  # default_init_weights(..., scale=0.1)
        self.weight = w
        # kernel_d2s = sparse_conv.weight.view(out_channels, -1); col = c*k*k + kh*k + kw
        self.kernel_d2s = w.reshape(out_planes, -1)
        self._kernel_d2s_c = self.kernel_d2s.astype(compute_dtype)   # cast once at init
        self._forward = jax.jit(functools.partial(
            _sparse_conv2d_forward, kernel_size=kernel_size,
            compute_dtype=compute_dtype, out_dtype=out_dtype))

    def mask_select(self, feature, h_idx, w_idx):
        # f32 reference-precision gather (used by the checks below).
        return _mask_select(feature, h_idx, w_idx,
                            kernel_size=self.kernel_size, compute_dtype=jnp.float32)

    def __call__(self, feature, h_idx, w_idx):
        # gather (bf16) + Pallas matmul under one jit; no f32 slab, no pad copies.
        return self._forward(self._kernel_d2s_c, feature, h_idx, w_idx)


if __name__ == "__main__":
    key = jax.random.PRNGKey(0)
    k_w, k_x, k_sel, k_w1 = jax.random.split(key, 4)

    in_planes, out_planes, ksize = 4, 8, 3
    H = W = 16
    feature = jax.random.normal(k_x, (1, in_planes, H, W), dtype=jnp.float32)

    # Sparse locations: all H*W pixels in row-major order (num = 256).
    hh, ww = jnp.meshgrid(jnp.arange(H), jnp.arange(W), indexing="ij")
    h0 = hh.reshape(-1).astype(jnp.int32)
    w0 = ww.reshape(-1).astype(jnp.int32)
    kh, kw = jnp.meshgrid(jnp.arange(ksize), jnp.arange(ksize), indexing="ij")
    # Indices into the zero-padded feature; kpos = kh*3 + kw matches the (in, kh, kw)
    # flattening of kernel_d2s.
    h_idx = h0[None, :] + kh.reshape(-1)[:, None].astype(jnp.int32)   # (9, num)
    w_idx = w0[None, :] + kw.reshape(-1)[:, None].astype(jnp.int32)   # (9, num)

    mod = SparseConv2d(in_planes, out_planes, ksize, k_w, init_weight=True)
    out = mod(feature, h_idx, w_idx)                                  # (out_planes, num)
    jax.block_until_ready(out)

    # Reference 1: plain-JAX matmul of the same gathered features with the same
    # bf16 input rounding / f32 accumulation as the kernel -> tight tolerance.
    sparse_feature = mod.mask_select(feature, h_idx, w_idx)
    w_bf = mod.kernel_d2s.astype(jnp.bfloat16).astype(jnp.float32)
    f_bf = sparse_feature.astype(jnp.bfloat16).astype(jnp.float32)
    ref_mm = w_bf @ f_bf
    np.testing.assert_allclose(np.asarray(out), np.asarray(ref_mm), rtol=1e-3, atol=1e-4)

    # Reference 2: full-pixel coverage must equal a dense 3x3 conv (padding=1, no bias)
    # flattened over H*W, up to bf16 input rounding.
    ref_conv = jax.lax.conv_general_dilated(
        feature, mod.weight, window_strides=(1, 1), padding=((1, 1), (1, 1)),
        dimension_numbers=("NCHW", "OIHW", "NCHW"))
    np.testing.assert_allclose(
        np.asarray(out), np.asarray(ref_conv[0].reshape(out_planes, -1)),
        rtol=2e-2, atol=2e-2)

    # Reference 3: ragged num (not a multiple of the 128-lane tile) exercises the
    # cdiv grid / masked last-block store path that replaced the N padding.
    sel = jax.random.permutation(k_sel, H * W)[:200]
    h_idx_r, w_idx_r = h_idx[:, sel], w_idx[:, sel]
    out_r = mod(feature, h_idx_r, w_idx_r)
    jax.block_until_ready(out_r)
    f_bf_r = mod.mask_select(feature, h_idx_r, w_idx_r).astype(jnp.bfloat16).astype(jnp.float32)
    np.testing.assert_allclose(np.asarray(out_r), np.asarray(w_bf @ f_bf_r),
                               rtol=1e-3, atol=1e-4)

    # Reference 4: kernel_size == 1 branch (feature[0, :, h_idx, w_idx]).
    mod1 = SparseConv2d(in_planes, out_planes, 1, k_w1, init_weight=True)
    out1 = mod1(feature, h0, w0)
    jax.block_until_ready(out1)
    f1 = mod1.mask_select(feature, h0, w0).astype(jnp.bfloat16).astype(jnp.float32)
    w1_bf = mod1.kernel_d2s.astype(jnp.bfloat16).astype(jnp.float32)
    np.testing.assert_allclose(np.asarray(out1), np.asarray(w1_bf @ f1),
                               rtol=1e-3, atol=1e-4)

    print("KERNEL_OK")
</pallas_src>

<mosaic_0001>
module attributes {stable_mosaic.version = 11 : i64} {
  func.func @_sparse_mm_kernel(%arg0: i32, %arg1: memref<8x36xbf16, #tpu.memory_space<vmem>>, %arg2: memref<36x128xbf16, #tpu.memory_space<vmem>>, %arg3: memref<8x128xf32, #tpu.memory_space<vmem>>) attributes {dimension_semantics = [#tpu.dimension_semantics<parallel>], iteration_bounds = array<i64: 2>, scalar_prefetch = 0 : i64, scratch_operands = 0 : i64, tpu.core_type = #tpu.core_type<tc>, window_params = [{pipeline_mode = #tpu.pipeline_mode<synchronous>, transform_indices = @transform_0, window_bounds = array<i64: 8, 36>}, {transform_indices = @transform_1, window_bounds = array<i64: 36, 128>}, {transform_indices = @transform_2, window_bounds = array<i64: 8, 128>}]} {
    %c0 = arith.constant 0 : index
    %c0_0 = arith.constant 0 : index
    %0 = vector.load %arg1[%c0, %c0_0] : memref<8x36xbf16, #tpu.memory_space<vmem>>, vector<8x36xbf16>
    %c0_1 = arith.constant 0 : index
    %c0_2 = arith.constant 0 : index
    %1 = vector.load %arg2[%c0_1, %c0_2] : memref<36x128xbf16, #tpu.memory_space<vmem>>, vector<36x128xbf16>
    %cst = arith.constant dense<0.000000e+00> : vector<8x128xf32>
    %2 = tpu.matmul %0, %1, %cst {dimension_numbers = #tpu.dot_dimension_numbers<[1], [0], [0], [1], [0, 0, 1, 1], [], []>} : vector<8x36xbf16>, vector<36x128xbf16>, vector<8x128xf32> -> vector<8x128xf32>
    %c0_3 = arith.constant 0 : index
    %c0_4 = arith.constant 0 : index
    %3 = vector.load %arg3[%c0_3, %c0_4] : memref<8x128xf32, #tpu.memory_space<vmem>>, vector<8x128xf32>
    tpu.vector_store %arg3[%c0_3, %c0_4], %2 {strides = array<i32>} : memref<8x128xf32, #tpu.memory_space<vmem>>, vector<8x128xf32>,
    return
  }
  func.func @transform_0(%arg0: i32) -> (i32, i32) {
    %c0_i32 = arith.constant 0 : i32
    %c0_i32_0 = arith.constant 0 : i32
    %c0_i32_1 = arith.constant 0 : i32
    return %c0_i32, %c0_i32_0 : i32, i32
  }
  func.func @transform_1(%arg0: i32) -> (i32, i32) {
    %c0_i32 = arith.constant 0 : i32
    %c0_i32_0 = arith.constant 0 : i32
    return %c0_i32, %arg0 : i32, i32
  }
  func.func @transform_2(%arg0: i32) -> (i32, i32) {
    %c0_i32 = arith.constant 0 : i32
    %c0_i32_0 = arith.constant 0 : i32
    return %c0_i32, %arg0 : i32, i32
  }
}

</mosaic_0001>

<bundles_post_ra>
// kernel: _sparse_conv2d_forward.1
= control target key start
LH: loop header
LB: loop body
LE: loop exit
PB: predicated region body
PF: predicated region fallthrough
CT: control target
= control target key end

     0   :  { %7 = vsyncpa [#allocation4], 0  ;;  %s617_s0 = inlined_call_operand.vmem [shape: bf16[8,36], index: 0, kind: input, shape index: {}]   ;;  %s618_s1 = inlined_call_operand.vmem [shape: bf16[36,256], index: 1, kind: input, shape index: {}]   ;;  %s619_s2 = inlined_call_operand.hbm [shape: f32[8,256], index: 2, kind: output, shape index: {}]  }
   0x1   :  { %9 = vsyncpa [#allocation4 + $0x1], 0  ;;  %s505_s9 = smov 0   ;;  %s507_s10 = smov 0  }
   0x2   :  { %s509_s11 = smov 0   ;;  %s511_s12 = smov 0  }
   0x3 LB: > { %s350_s13 = sadd.s32 4294967295, %s485_s12   ;;  %s351_s14 = sadd.s32 4294967294, %s485_s12   ;;  %s485_s12 = sphi %s511_s12, %s625_s12   ;;  %s481_s11 = sphi %s509_s11, %s624_s11   ;;  %s477_s10 = sphi %s507_s10, %s623_s10   ;;  %s473_s9 = sphi %s505_s9, %s622_s9  }
   0x4   : > { %s528_s15 = sadd.s32 1, %s485_s12   ;;  %s43_s16 = sadd.s32 1, %s481_s11 }
   0x5   : > { %s40_s17 = ssub.s32 %s485_s12, %s528_s15  ;;  %p50_p0 = scmp.ne.s32.totalorder %s481_s11, %s477_s10 }
   0x6   : > { %p41_p1 = scmp.eq.s32.totalorder %s40_s17, 0  ;;  %p51_p2 = scmp.eq.s32.totalorder %s485_s12, 0 }
   0x7   : > { %p80_p3 = scmp.eq.s32.totalorder %s350_s13, 1  ;;  %p85_p4 = scmp.ne.s32.totalorder %s477_s10, %s473_s9 }
   0x8   : > { %s541_s18 = scalar_select %p41_p1, %s481_s11, %s43_s16  }
   0x9   : > { %p52_p5 = por %p51_p2, %p50_p0  ;;  %p543_p6 = por %p80_p3, %p50_p0 }
   0xa   : > { %p86_p7 = scmp.eq.s32.totalorder %s351_s14, 1  ;;  %p353_p9 = scmp.ge.s32.totalorder %s485_s12, 2 }
   0xc   : > { %p547_p8 = por %p86_p7, %p85_p4  ;;  %105 = sbr.rel (%p353_p9) target bundleno = 25 (0x19), region = 20 }
  0x11   : > { %108 = sbr.rel (!%p52_p5) target bundleno = 25 (0x19), region = 24  ;;  %s110_s21 = sand.u32 (%p52_p5), 1, %s481_s11  }
  0x12   : > { %s354_s22 = sshll.u32 (%p52_p5), %s485_s12, 2  ;;  %s379_s23 = smul.u32 (%p52_p5), 20, %s110_s21 }
  0x13   : > { %s114_s26 = scalar_lea.vmem (%p52_p5), %s618_s1, %s354_s22 }
  0x14   : > { %v131_v0 = vld [vmem:[%s114_s26] sm:$0xf] (%p52_p5)  ;;  %v133_v1 = vld [vmem:[%s114_s26 + $0x8] sm:$0xf] (%p52_p5)  ;;  %v135_v2 = vld [vmem:[%s114_s26 + $0x10] sm:$0xf] (%p52_p5) }
  0x15   : > { %v137_v3 = vld [vmem:[%s114_s26 + $0x18] sm:$0xf] (%p52_p5)  ;;  %v139_v4 = vld [vmem:[%s114_s26 + $0x20] sm:$0xf] (%p52_p5)  ;;  %s112_s27 = scalar_lea.vmem (%p52_p5), [#allocation2], %s379_s23 }
  0x16   : > { %132 = vst [vmem:[%s112_s27] sm:$0xf] %v131_v0  ;;  %134 = vst [vmem:[%s112_s27 + $0x4] sm:$0xf] %v133_v1 }
  0x17   : > { %136 = vst [vmem:[%s112_s27 + $0x8] sm:$0xf] %v135_v2  ;;  %138 = vst [vmem:[%s112_s27 + $0xc] sm:$0xf] %v137_v3 }
  0x18   : > { %140 = vst [vmem:[%s112_s27 + $0x10] sm:$0xf] %v139_v4 }
  0x19 PF: > { %p355_p10 = scmp.ge.s32.totalorder %s485_s12, 1  ;;  %p173_p11 = scmp.lt.s32.totalorder %s485_s12, 3 }
  0x1b   : > { %p174_p12 = pnand %p355_p10, %p173_p11 }
  0x1c   : > { %s562_s28 = sand.u32 (!%p174_p12), 1, %s477_s10   ;;  %s362_s8 = sshll.u32 (!%p174_p12), %s350_s13, 7 }
  0x1d   : > { %177 = sbr.rel (%p174_p12) target bundleno = 256 (0x100), region = 65  ;;  %s356_s5 = sshll.u32 (!%p174_p12), %s562_s28, 3 }
  0x1e   : > { %s380_s29 = smul.u32 (!%p174_p12), 20, %s562_s28  ;;  %s200_s6 = scalar_lea.vmem (!%p174_p12), [#allocation3], %s356_s5 }
  0x1f   : > { %s286_s7 = sshll.u32 (!%p174_p12), %s200_s6, 4  ;;  %s576_s17 = scalar_lea.hbm (!%p174_p12), %s619_s2, %s362_s8  ;;  %s571_s7 = int_to_ptr.vmem [resolvable:$true] %s286_s7 }
  0x20   : > { %s182_s30 = scalar_lea.vmem (!%p174_p12), [#allocation2], %s380_s29  ;;  %s273_s21 = scalar_lea.sflag (!%p174_p12), [#allocation4], %s562_s28 }
  0x21   : > { %s425_s22 = scalar_lea.vmem (!%p174_p12), %s571_s7, 128  ;;  %s489_s13 = smov (!%p174_p12), [#allocation3]  }
  0x22   : > { %v487_v5 = vmov 0.0   ;;  %vm488_vm0 = vmmov 0   ;;  %vm227_vm1 = vcmask 1041408   ;;  %v422_v6 = vld [vmem:[%s182_s30 + $0x10] ss:$0 sps:$4 sm:$0x33]   ;;  %p426_p13 = scmp.ne.s32.totalorder %s571_s7, %s425_s22 }
  0x23   : > { %369 = vmatprep.subr.bf16.mxu0 %v487_v5  ;;  %375 = vmatprep.mubr.msk.bf16.mxu0 %vm488_vm0, %v487_v5  ;;  %v229_v7 = vsel %vm227_vm1, %v422_v6, 0  ;;  %v423_v8 = vld [vmem:[%s182_s30 + $0x8] sm:$0xff]   ;;  %v424_v9 = vld [vmem:[%s182_s30] sm:$0xff]   ;;  %vm223_vm2 = vcmask 293888   ;;  %s429_s23 = sshll.u32 %s489_s13, 4  ;;  %s430_s23 = int_to_ptr.vmem [resolvable:$false] %s429_s23 }
  0x24   : > { %370 = vmatpush3.bf16.msra.mxu0 %v229_v7  ;;  %v202_v10 = vld [vmem:[%s617_s0] sm:$0xf]  ;;  %p427_p0 = pnand %p426_p13, %p543_p6  ;;  %s431_s24 = scalar_lea.vmem %s430_s23, 256 }
  0x25   : > { %371 = vmatprep.subr.bf16.mxu0 %v487_v5  ;;  %p432_p2 = scmp.lt.s32.totalorder %s571_s7, %s430_s23  ;;  %p433_p3 = scmp.lt.s32.totalorder %s431_s24, %s425_s22 }
  0x26   : > { %p428_p1 = pneg %p427_p0 }
  0x27   : > { %p434_p4 = por %p433_p3, %p432_p2 }
  0x28   : > { %372 = vmatpush3.bf16.msra.mxu0 %v423_v8 }
  0x29   : > { %373 = vmatprep.subr.bf16.mxu0 %v487_v5  ;;  %p435_p5 = pnand %p434_p4, %p428_p1 }
  0x2c   : > { %374 = vmatpush3.bf16.msra.mxu0 %v424_v9 }
  0x2f   : > { %376 = vmatmul.mubr.msk.bf16.vlgmr.msra.gmra.mxu0 %vm223_vm2, %v202_v10 }
  0xef   : > { %v265_v11 = vpop.f32.mrf.mxu0 }
  0xf0   : > { %271 = vst [vmem:[%s200_s6] sm:$0xff] %v265_v11 }
  0xf1   : > { %v377_v12 = vpop.f32.mrf.mxu0 }
  0xf2   : > { %438 = shalt.err (!%p435_p5)
}
  0xf3   : > { %s439_s25 = scalar_lea.hbm %s576_s17, 128  ;;  %s443_s28 = scalar_lea.hbm %s619_s2, 256 }
  0xf4   : > { %p440_p7 = scmp.ne.s32.totalorder %s576_s17, %s439_s25  ;;  %p444_p12 = scmp.lt.s32.totalorder %s576_s17, %s619_s2 }
  0xf5   : > { %p445_p13 = scmp.lt.s32.totalorder %s443_s28, %s439_s25 }
  0xf6   : > { %p441_p10 = pnand %p440_p7, %p543_p6 }
  0xf7   : > { %p446_p0 = por %p445_p13, %p444_p12 }
  0xf8   : > { %p442_p11 = pneg %p441_p10 }
  0xfa   : > { %p447_p1 = pnand %p446_p0, %p442_p11 }
  0xfc   : > { %450 = shalt.err (!%p447_p1)
}
  0xfd   : > { %381 = dma.vmem_to_hbm [thread:$0]  (%p543_p6), %s571_s7, 128, %s576_s17, %s273_s21   ;;  %v268_v13 = vpop.f32.mrf.mxu0 }
  0xff   : > { %v378_v14 = vpop.f32.mrf.mxu0 }
 0x100 PF: > { %s298_s3 = sand.u32 1, %s473_s9   ;;  %p384_p2 = pnand %p353_p9, %p547_p8 }
 0x101   : > { %s299_s4 = scalar_lea.sflag [#allocation4], %s298_s3 }
 0x102   : > { %p385_p3 = pneg %p384_p2 }
 0x104   : > { %468 = dma.done.wait (%p385_p3), %s299_s4, 128  }
 0x105   : > { %470 = vsyncadd (%p385_p3), %s299_s4, 4294967168  ;;  %p12_p6 = scmp.ge.s32.totalorder %s528_s15, 4   ;;  %s622_s9 = smov %s477_s10 }
 0x106   : > { %s623_s10 = smov %s481_s11  ;;  %s624_s11 = smov %s541_s18 }
 0x107   : > { %s625_s12 = smov %s528_s15  ;;  %14 = sbr.rel (!%p12_p6) target bundleno = 3 (0x3), region = 109 }
 0x10c   :  { %304 = vsyncpa [#allocation4], 1 }
 0x10d   :  { %306 = vsyncpa [#allocation4 + $0x1], 1 }

</bundles_post_ra>
